<compile_context>
chip_gen: v7x
topology: tpu7x:2x2x1
jax: 0.10.0
libtpu: 0.0.40
codegen_flags: <defaults>
</compile_context>

<pallas_src>
import jax
import jax.numpy as jnp
from jax.experimental import pallas as pl
from jax.experimental.pallas import tpu as pltpu


def _round_up(n, m):
    return (n + m - 1) // m * m


def _mlp_kernel(x_ref, w1_ref, b1_ref, w2_ref, b2_ref, o_ref):
    # x : (Bt, in_dim)  input dtype (cast in-kernel)
    # w1: (in_dim, hid_p)  compute dtype (weight-norm scale already folded in)
    # b1: (1, hid_p) f32
    # w2: (hid_p, out_dim) compute dtype (scale folded in)
    # b2: (1, out_dim) f32
    # o : (Bt, out_dim) f32
    x = x_ref[...].astype(w1_ref.dtype)            # in-kernel cast; no wrapper pass over x
    h = jnp.dot(x, w1_ref[...], preferred_element_type=jnp.float32)
    h = jnp.maximum(h + b1_ref[...], 0.0)          # bias + ReLU in f32
    # Dropout(p) -> identity at inference time.
    h = h.astype(w2_ref.dtype)                     # bf16 operand path (no-op for f32)
    out = jnp.dot(h, w2_ref[...], preferred_element_type=jnp.float32)
    o_ref[...] = (out + b2_ref[...]).astype(o_ref.dtype)


def prepare_params(params, compute_dtype=jnp.float32):
    """One-time param prep (outside the hot path).

    Folds weight_norm (dim=None) into the weights:  W_eff = (g/||V||_F) * V,
    multiplied in f32 BEFORE any bf16 cast, and zero-pads hid to a multiple of
    128 (lane-dense intermediate). out_dim and in_dim are left unpadded.

    params: v1 (in,hid), g1 scalar, b1 (hid,), v2 (hid,out), g2 scalar, b2 (out,)
            with v stored as (in_features, out_features) == PyTorch weight.T
    """
    v1 = params["v1"].astype(jnp.float32)
    v2 = params["v2"].astype(jnp.float32)
    in_dim, hid = v1.shape
    hid2, out_dim = v2.shape
    assert hid2 == hid
    hid_p = _round_up(hid, 128)

    w1 = (params["g1"].astype(jnp.float32) / jnp.linalg.norm(v1)) * v1
    w2 = (params["g2"].astype(jnp.float32) / jnp.linalg.norm(v2)) * v2

    w1_p = (jnp.zeros((in_dim, hid_p), jnp.float32)
            .at[:, :hid].set(w1).astype(compute_dtype))
    w2_p = (jnp.zeros((hid_p, out_dim), jnp.float32)
            .at[:hid, :].set(w2).astype(compute_dtype))
    b1_p = (jnp.zeros((1, hid_p), jnp.float32)
            .at[:, :hid].set(params["b1"].astype(jnp.float32)[None, :]))
    b2_p = params["b2"].astype(jnp.float32)[None, :]

    return {"w1": w1_p, "b1": b1_p, "w2": w2_p, "b2": b2_p}


def _pick_block_b(B, desired=1024):
    # Big tile to amortize the ~0.35 us per-step overhead, rounded to 16 for
    # bf16 (16,128) sublane packing, but capped so the grid has >= 2 steps
    # when B allows it (v7x has 2 TensorCores; "parallel" only helps with >= 2
    # grid steps).
    half = _round_up(-(-B // 2), 16)
    return max(16, min(desired, half))


def simple_classifier_forward(x, prep):
    """Fused forward: logits = ReLU(x @ W1 + b1) @ W2 + b2 (weight-norm folded)."""
    B, in_dim = x.shape
    hid_p, out_dim = prep["w2"].shape

    block_b = _pick_block_b(B)
    grid = (pl.cdiv(B, block_b),)      # last partial block handled by Pallas

    # Explicit VMEM budget: 2x-buffered x/out tiles + 2x-buffered resident
    # weights + intermediate h, with headroom; capped at v7x's 64 MiB.
    itemsize = lambda a: jnp.dtype(a.dtype).itemsize
    w_bytes = sum(prep[k].size * itemsize(prep[k]) for k in ("w1", "b1", "w2", "b2"))
    x_tile_bytes = block_b * in_dim * jnp.dtype(x.dtype).itemsize
    out_tile_bytes = block_b * out_dim * 4
    h_bytes = block_b * hid_p * 4
    vmem_limit = min(64 << 20,
                     2 * (x_tile_bytes + out_tile_bytes + w_bytes)
                     + 4 * h_bytes + (8 << 20))

    resident = lambda shape: pl.BlockSpec(shape, lambda i: (0, 0))  # VMEM-resident

    out = pl.pallas_call(
        _mlp_kernel,
        out_shape=jax.ShapeDtypeStruct((B, out_dim), jnp.float32),
        grid=grid,
        in_specs=[
            pl.BlockSpec((block_b, in_dim), lambda i: (i, 0)),   # x batch tiles
            resident(prep["w1"].shape),
            resident(prep["b1"].shape),
            resident(prep["w2"].shape),
            resident(prep["b2"].shape),
        ],
        out_specs=pl.BlockSpec((block_b, out_dim), lambda i: (i, 0)),
        compiler_params=pltpu.CompilerParams(
            dimension_semantics=("parallel",),      # shard batch tiles over TCs
            vmem_limit_bytes=int(vmem_limit)),
    )(x, prep["w1"], prep["b1"], prep["w2"], prep["b2"])

    return out   # exactly (B, out_dim): no post-kernel slice pass


def _reference(x, params):
    """Pure-JAX reference (matches the PyTorch module at eval time)."""
    w1 = params["g1"] * params["v1"] / jnp.linalg.norm(params["v1"])
    w2 = params["g2"] * params["v2"] / jnp.linalg.norm(params["v2"])
    h = jnp.maximum(x @ w1 + params["b1"], 0.0)
    return h @ w2 + params["b2"]


if __name__ == "__main__":
    in_dim, hid_dim, out_dim = 32, 64, 16
    dropout = 0.5  # unused at inference

    key = jax.random.PRNGKey(0)
    kx, kx2, k1, k2, kb1, kb2 = jax.random.split(key, 6)

    params = {
        # v stored as (in_features, out_features)  (= PyTorch weight.T)
        "v1": jax.random.normal(k1, (in_dim, hid_dim), dtype=jnp.float32) * 0.1,
        "g1": jnp.float32(1.7),   # scalar g (weight_norm dim=None)
        "b1": jax.random.normal(kb1, (hid_dim,), dtype=jnp.float32) * 0.1,
        "v2": jax.random.normal(k2, (hid_dim, out_dim), dtype=jnp.float32) * 0.1,
        "g2": jnp.float32(0.9),
        "b2": jax.random.normal(kb2, (out_dim,), dtype=jnp.float32) * 0.1,
    }

    fwd = jax.jit(simple_classifier_forward)

    # One-time param prep, off the hot path.
    prep32 = prepare_params(params, jnp.float32)
    prep16 = prepare_params(params, jnp.bfloat16)

    # Case 1: tiny batch, single grid step. f32 path: parity with reference.
    x = jax.random.normal(kx, (8, in_dim), dtype=jnp.float32)
    ref = _reference(x, params)
    logits = fwd(x, prep32)
    jax.block_until_ready(logits)
    assert logits.shape == (8, out_dim)
    assert jnp.allclose(logits, ref, atol=1e-5, rtol=1e-5), "f32 mismatch vs reference"

    # bf16 matmul-operand path (valid on v5e/v6e/v7x), f32 accumulate/elementwise.
    logits16 = fwd(x, prep16)
    jax.block_until_ready(logits16)
    assert logits16.shape == (8, out_dim)
    assert jnp.allclose(logits16, ref, atol=5e-2, rtol=5e-2), "bf16 mismatch vs reference"

    # Case 2: batch not a multiple of the tile -> 2 grid steps, partial last
    # block (exercises Pallas's masked last-block write; no wrapper padding).
    x2 = jax.random.normal(kx2, (40, in_dim), dtype=jnp.float32)
    ref2 = _reference(x2, params)
    logits2 = fwd(x2, prep32)
    jax.block_until_ready(logits2)
    assert logits2.shape == (40, out_dim)
    assert jnp.allclose(logits2, ref2, atol=1e-5, rtol=1e-5), "f32 mismatch (uneven batch)"

    print("KERNEL_OK")
</pallas_src>

<mosaic_0001>
module attributes {stable_mosaic.version = 11 : i64} {
  func.func @_mlp_kernel(%arg0: i32, %arg1: memref<16x32xf32, #tpu.memory_space<vmem>>, %arg2: memref<32x128xf32, #tpu.memory_space<vmem>>, %arg3: memref<1x128xf32, #tpu.memory_space<vmem>>, %arg4: memref<128x16xf32, #tpu.memory_space<vmem>>, %arg5: memref<1x16xf32, #tpu.memory_space<vmem>>, %arg6: memref<16x16xf32, #tpu.memory_space<vmem>>) attributes {dimension_semantics = [#tpu.dimension_semantics<parallel>], iteration_bounds = array<i64: 1>, scalar_prefetch = 0 : i64, scratch_operands = 0 : i64, tpu.core_type = #tpu.core_type<tc>, window_params = [{transform_indices = @transform_0, window_bounds = array<i64: 16, 32>}, {pipeline_mode = #tpu.pipeline_mode<synchronous>, transform_indices = @transform_1, window_bounds = array<i64: 32, 128>}, {pipeline_mode = #tpu.pipeline_mode<synchronous>, transform_indices = @transform_2, window_bounds = array<i64: 1, 128>}, {pipeline_mode = #tpu.pipeline_mode<synchronous>, transform_indices = @transform_3, window_bounds = array<i64: 128, 16>}, {pipeline_mode = #tpu.pipeline_mode<synchronous>, transform_indices = @transform_4, window_bounds = array<i64: 1, 16>}, {transform_indices = @transform_5, window_bounds = array<i64: 16, 16>}]} {
    %c0 = arith.constant 0 : index
    %c0_0 = arith.constant 0 : index
    %0 = vector.load %arg1[%c0, %c0_0] : memref<16x32xf32, #tpu.memory_space<vmem>>, vector<16x32xf32>
    %c0_1 = arith.constant 0 : index
    %c0_2 = arith.constant 0 : index
    %1 = vector.load %arg2[%c0_1, %c0_2] : memref<32x128xf32, #tpu.memory_space<vmem>>, vector<32x128xf32>
    %cst = arith.constant dense<0.000000e+00> : vector<16x128xf32>
    %2 = tpu.matmul %0, %1, %cst {dimension_numbers = #tpu.dot_dimension_numbers<[1], [0], [0], [1], [0, 0, 1, 1], [], []>} : vector<16x32xf32>, vector<32x128xf32>, vector<16x128xf32> -> vector<16x128xf32>
    %c0_3 = arith.constant 0 : index
    %c0_4 = arith.constant 0 : index
    %3 = vector.load %arg3[%c0_3, %c0_4] : memref<1x128xf32, #tpu.memory_space<vmem>>, vector<1x128xf32>
    %4 = vector.broadcast %3 : vector<1x128xf32> to vector<16x128xf32>
    %5 = arith.addf %2, %4 : vector<16x128xf32>
    %cst_5 = arith.constant 0.000000e+00 : f32
    %6 = vector.broadcast %cst_5 : f32 to vector<16x128xf32>
    %7 = arith.maximumf %5, %6 : vector<16x128xf32>
    %c0_6 = arith.constant 0 : index
    %c0_7 = arith.constant 0 : index
    %8 = vector.load %arg4[%c0_6, %c0_7] : memref<128x16xf32, #tpu.memory_space<vmem>>, vector<128x16xf32>
    %cst_8 = arith.constant dense<0.000000e+00> : vector<16x16xf32>
    %9 = tpu.matmul %7, %8, %cst_8 {dimension_numbers = #tpu.dot_dimension_numbers<[1], [0], [0], [1], [0, 0, 1, 1], [], []>} : vector<16x128xf32>, vector<128x16xf32>, vector<16x16xf32> -> vector<16x16xf32>
    %c0_9 = arith.constant 0 : index
    %c0_10 = arith.constant 0 : index
    %10 = vector.load %arg5[%c0_9, %c0_10] : memref<1x16xf32, #tpu.memory_space<vmem>>, vector<1x16xf32>
    %11 = vector.broadcast %10 : vector<1x16xf32> to vector<16x16xf32>
    %12 = arith.addf %9, %11 : vector<16x16xf32>
    %c0_11 = arith.constant 0 : index
    %c0_12 = arith.constant 0 : index
    %13 = vector.load %arg6[%c0_11, %c0_12] : memref<16x16xf32, #tpu.memory_space<vmem>>, vector<16x16xf32>
    tpu.vector_store %arg6[%c0_11, %c0_12], %12 {strides = array<i32>} : memref<16x16xf32, #tpu.memory_space<vmem>>, vector<16x16xf32>,
    return
  }
  func.func @transform_0(%arg0: i32) -> (i32, i32) {
    %c0_i32 = arith.constant 0 : i32
    %c0_i32_0 = arith.constant 0 : i32
    return %arg0, %c0_i32 : i32, i32
  }
  func.func @transform_1(%arg0: i32) -> (i32, i32) {
    %c0_i32 = arith.constant 0 : i32
    %c0_i32_0 = arith.constant 0 : i32
    %c0_i32_1 = arith.constant 0 : i32
    return %c0_i32, %c0_i32_0 : i32, i32
  }
  func.func @transform_2(%arg0: i32) -> (i32, i32) {
    %c0_i32 = arith.constant 0 : i32
    %c0_i32_0 = arith.constant 0 : i32
    %c0_i32_1 = arith.constant 0 : i32
    return %c0_i32, %c0_i32_0 : i32, i32
  }
  func.func @transform_3(%arg0: i32) -> (i32, i32) {
    %c0_i32 = arith.constant 0 : i32
    %c0_i32_0 = arith.constant 0 : i32
    %c0_i32_1 = arith.constant 0 : i32
    return %c0_i32, %c0_i32_0 : i32, i32
  }
  func.func @transform_4(%arg0: i32) -> (i32, i32) {
    %c0_i32 = arith.constant 0 : i32
    %c0_i32_0 = arith.constant 0 : i32
    %c0_i32_1 = arith.constant 0 : i32
    return %c0_i32, %c0_i32_0 : i32, i32
  }
  func.func @transform_5(%arg0: i32) -> (i32, i32) {
    %c0_i32 = arith.constant 0 : i32
    %c0_i32_0 = arith.constant 0 : i32
    return %arg0, %c0_i32 : i32, i32
  }
}

</mosaic_0001>

<bundles_post_ra>
// kernel: simple_classifier_forward.1
= control target key start
LH: loop header
LB: loop body
LE: loop exit
PB: predicated region body
PF: predicated region fallthrough
CT: control target
= control target key end

     0   :  { %10 = vsyncpa [#allocation3], 0  ;;  %vm34_vm0 = vcmask 261120   ;;  %vm216_vm1 = vcmask 130048   ;;  %s495_s0 = inlined_call_operand.vmem [shape: f32[8,32], index: 0, kind: input, shape index: {}]   ;;  %s496_s1 = inlined_call_operand.vmem [shape: f32[32,128], index: 1, kind: input, shape index: {}]   ;;  %s497_s2 = inlined_call_operand.vmem [shape: f32[1,128], index: 2, kind: input, shape index: {}]   ;;  %s498_s3 = inlined_call_operand.vmem [shape: f32[128,16], index: 3, kind: input, shape index: {}]   ;;  %s499_s4 = inlined_call_operand.vmem [shape: f32[1,16], index: 4, kind: input, shape index: {}]   ;;  %s500_s5 = inlined_call_operand.hbm [shape: f32[8,16], index: 5, kind: output, shape index: {}]  }
   0x1   :  { %v23_v0 = vld [vmem:[%s496_s1] sm:$0xff]  ;;  %v24_v1 = vld [vmem:[%s496_s1 + $0x8] sm:$0xff]  ;;  %v25_v3 = vld [vmem:[%s496_s1 + $0x10] sm:$0xff] }
   0x2   :  { %v309_v2 = vpack.c.bf16 %v24_v1, %v23_v0  ;;  %v26_v4 = vld [vmem:[%s496_s1 + $0x18] sm:$0xff]  ;;  %v21_v5 = vld [vmem:[%s495_s0] sm:$0xff]  ;;  %v119_v8 = vld [vmem:[%s498_s3 + $0x8] sm:$0xff] }
   0x3   :  { %v313_v6 = vpack.c.bf16 %v26_v4, %v25_v3  ;;  %271 = vmatprep.mubr.msk.f32.mxu0 %vm34_vm0, %v21_v5  ;;  %v118_v7 = vld [vmem:[%s498_s3] sm:$0xff]  ;;  %v120_v10 = vld [vmem:[%s498_s3 + $0x10] sm:$0xff]  ;;  %v121_v11 = vld [vmem:[%s498_s3 + $0x18] sm:$0xff] }
   0x4   :  { %310 = vmatprep.subr.bf16.mxu0 %v309_v2  ;;  %v317_v9 = vpack.c.bf16 %v119_v8, %v118_v7  ;;  %v321_v12 = vpack.c.bf16 %v121_v11, %v120_v10  ;;  %v122_v13 = vld [vmem:[%s498_s3 + $0x20] sm:$0xff]  ;;  %v123_v14 = vld [vmem:[%s498_s3 + $0x28] sm:$0xff]  ;;  %v124_v17 = vld [vmem:[%s498_s3 + $0x30] sm:$0xff] }
   0x5   :  { %312 = vmatpush3.bf16.msra.mxu0 %v309_v2  ;;  %v325_v15 = vpack.c.bf16 %v123_v14, %v122_v13  ;;  %v22_v16 = vld [vmem:[%s495_s0 + $0x8] sm:$0xff]  ;;  %v125_v18 = vld [vmem:[%s498_s3 + $0x38] sm:$0xff]  ;;  %v126_v20 = vld [vmem:[%s498_s3 + $0x40] sm:$0xff] }
   0x6   :  { %314 = vmatprep.subr.bf16.mxu0 %v313_v6  ;;  %318 = vmatprep.subr.bf16.mxu1 %v317_v9  ;;  %v329_v19 = vpack.c.bf16 %v125_v18, %v124_v17  ;;  %v127_v21 = vld [vmem:[%s498_s3 + $0x48] sm:$0xff]  ;;  %v128_v23 = vld [vmem:[%s498_s3 + $0x50] sm:$0xff]  ;;  %v129_v24 = vld [vmem:[%s498_s3 + $0x58] sm:$0xff] }
   0x7   :  { %320 = vmatpush3.bf16.msra.mxu1 %v317_v9  ;;  %v333_v22 = vpack.c.bf16 %v127_v21, %v126_v20  ;;  %v337_v25 = vpack.c.bf16 %v129_v24, %v128_v23  ;;  %v130_v26 = vld [vmem:[%s498_s3 + $0x60] sm:$0xff]  ;;  %v131_v27 = vld [vmem:[%s498_s3 + $0x68] sm:$0xff]  ;;  %v132_v29 = vld [vmem:[%s498_s3 + $0x70] sm:$0xff] }
   0x8   :  { %322 = vmatprep.subr.bf16.mxu1 %v321_v12  ;;  %v341_v28 = vpack.c.bf16 %v131_v27, %v130_v26  ;;  %v133_v30 = vld [vmem:[%s498_s3 + $0x78] sm:$0xff]  ;;  %v235_v32 = vld [vmem:[%s497_s2] ss:$0 sm:$0xff] }
   0x9   :  { %316 = vmatpush3.bf16.msra.mxu0 %v313_v6  ;;  %v345_v31 = vpack.c.bf16 %v133_v30, %v132_v29  ;;  %v238_v39 = vld [vmem:[%s499_s4] ss:$0 sm:$0xff] }
   0xb   :  { %324 = vmatpush3.bf16.msra.mxu1 %v321_v12 }
   0xc   :  { %272 = vmatmul.mubr.msk.f32.vlgmr.msra.gmra.mrb[0].mxu0 %vm34_vm0, %v22_v16  ;;  %326 = vmatprep.subr.bf16.mxu1 %v325_v15 }
   0xf   :  { %328 = vmatpush3.bf16.msra.mxu1 %v325_v15 }
  0x10   :  { %330 = vmatprep.subr.bf16.mxu1 %v329_v19 }
  0x13   :  { %332 = vmatpush3.bf16.msra.mxu1 %v329_v19 }
  0x14   :  { %334 = vmatprep.subr.bf16.mxu1 %v333_v22 }
  0x17   :  { %336 = vmatpush3.bf16.msra.mxu1 %v333_v22 }
  0x18   :  { %338 = vmatprep.subr.bf16.mxu1 %v337_v25 }
  0x1b   :  { %340 = vmatpush3.bf16.msra.mxu1 %v337_v25 }
  0x1c   :  { %342 = vmatprep.subr.bf16.mxu1 %v341_v28 }
  0x1f   :  { %344 = vmatpush3.bf16.msra.mxu1 %v341_v28 }
  0x20   :  { %346 = vmatprep.subr.bf16.mxu1 %v345_v31 }
  0x23   :  { %348 = vmatpush3.bf16.msra.mxu1 %v345_v31 }
  0xdf   :  { %v273_v33 = vpop.f32.mrb[0].mxu0 }
  0xe0   :  { %v113_v34 = vadd.f32 %v273_v33, %v235_v32  ;;  %v107_v35 = vpop.f32.mrb[1].mxu0 }
  0xe1   :  { %v108_v36 = vadd.f32 %v235_v32, %v107_v35 }
  0xe2   :  { %v117_v38 = vmax.f32 %v113_v34, 0.0 }
  0xe3   :  { %v116_v37 = vmax.f32 %v108_v36, 0.0 }
  0xe5   :  { %306 = vmatprep.mubr.f32.mxu1 %v116_v37 }
  0xe6   :  { %307 = vmatmul.mubr.f32.vlgmr.msra.gmra.mrb[0].mxu1 %v117_v38 }
 0x1b9   :  { %v308_v40 = vpop.f32.mrb[0].mxu1 }
 0x1ba   :  { %v213_v41 = vadd.f32 %v308_v40, %v238_v39  ;;  %v207_v42 = vpop.f32.mrb[1].mxu1 }
 0x1bb   :  { %v208_v43 = vadd.f32 %v238_v39, %v207_v42 }
 0x1bc   :  { %218 = vst.msk [vmem:[#allocation2 + $0x8] sm:$0xff] %vm216_vm1, %v213_v41 }
 0x1bd   :  { %217 = vst.msk [vmem:[#allocation2] sm:$0xff] %vm216_vm1, %v208_v43 }
 0x1be   :  { %223 = vsyncadd [#allocation3], 128  ;;  %s376_s2 = smov [#allocation2]  }
 0x1bf   :  { %s224_s3 = sshll.u32 %s376_s2, 4  ;;  %s225_s3 = int_to_ptr.vmem [resolvable:$true] %s224_s3 }
 0x1c0   :  { %s352_s13 = scalar_lea.vmem %s225_s3, 128  ;;  %s356_s14 = scalar_lea.vmem %s225_s3, 256 }
 0x1c1   :  { %p353_p0 = scmp.ne.s32.totalorder %s225_s3, %s352_s13  ;;  %p357_p1 = scmp.lt.s32.totalorder %s225_s3, %s225_s3 }
 0x1c2   :  { %p358_p2 = scmp.lt.s32.totalorder %s356_s14, %s352_s13 }
 0x1c4   :  { %p359_p3 = por %p358_p2, %p357_p1 }
 0x1c6   :  { %p360_p4 = pnand %p359_p3, %p353_p0 }
 0x1c8   :  { %363 = shalt.err (!%p360_p4)
}
 0x1c9   :  { %s364_s16 = scalar_lea.hbm %s500_s5, 128 }
 0x1ca   :  { %p365_p5 = scmp.ne.s32.totalorder %s500_s5, %s364_s16  ;;  %p368_p6 = scmp.lt.u32.totalorder %s364_s16, %s500_s5 }
 0x1cc   :  { %p370_p7 = pnand %p368_p6, %p365_p5 }
 0x1ce   :  { %373 = shalt.err (!%p370_p7)
}
 0x1cf   :  { %s377_s21 = smov 128   ;;  %s378_s22 = smov 8  }
 0x1d0   :  { %230 = dma.vmem_to_hbm [thread:$0]  %s225_s3, 128, %s500_s5, [#allocation3], %s377_s21, %s377_s21, %s378_s22  }
 0x1d1   :  { %374 = dma.done.wait [#allocation3], 256  }
 0x1d2   :  { %375 = vsyncadd [#allocation3], 4294967040 }
 0x1d3   :  { %234 = vsyncpa [#allocation3], 1 }

</bundles_post_ra>
